<compile_context>
chip_gen: v5e
topology: v5e:2x2
jax: 0.10.0
libtpu: 0.0.40
codegen_flags: <defaults>
</compile_context>

<pallas_src>
import functools

import jax
import jax.numpy as jnp
from jax.experimental import pallas as pl
from jax.experimental.pallas import tpu as pltpu

_SQRT_HALF = 0.7071067811865476
_LN_EPS = 1e-5                      # torch.nn.LayerNorm default eps

# Abramowitz & Stegun 7.1.26 erf coefficients, pre-scaled so that
#   gelu(x) = relu(x) - |x| * Q(t) * exp(-x^2/2),  t = 1/(1 + (p/sqrt2)*|x|)
# (the 0.5 of gelu and the sign select/multiply of erf are folded away).
_GELU_P = 0.3275911 * _SQRT_HALF
_GELU_A = tuple(0.5 * a for a in
                (0.254829592, -0.284496736, 1.421413741, -1.453152027,
                 1.061405429))


def _gelu_exact(x):
    """torch F.gelu(approximate='none'): 0.5*x*(1+erf(x/sqrt(2))).

    Rewritten as relu(x) - |x|*Q(t)*exp(-x^2/2).  The divide runs on the EUP
    via the approximate reciprocal (own VLIW slot) and exp also runs on the
    EUP, so the VALU cost is just the polynomial plus a few mul/max ops.
    """
    a1, a2, a3, a4, a5 = _GELU_A
    ax = jnp.abs(x)
    t = pl.reciprocal(1.0 + _GELU_P * ax, approx=True)
    q = ((((a5 * t + a4) * t + a3) * t + a2) * t + a1) * t
    return jnp.maximum(x, 0.0) - ax * q * jnp.exp(-0.5 * (ax * ax))


def edge_nri_kernel(node_ref, edges_in_ref,
                    wcat_ref, wn_b_ref,
                    se_w1_ref, se_b1_ref, se_w2_ref, se_b2_ref,
                    v_w1_ref, v_b1_ref, v_w2_ref, v_b2_ref,
                    ez_ref, val_ref, *, kc, nchunks):
    """One grid step = `kb` graphs; processed in `nchunks` chunks of `kc`
    graphs so live temporaries stay ~chunk-sized while DMA tiles stay big."""
    kb, n, d = node_ref.shape          # graphs-per-block, atoms, features
    e = n * n
    rows_c = kc * e                    # edge rows per chunk
    cdt = jnp.bfloat16                 # MXU operand dtype (f32 accumulation)

    # Loop-invariant weight loads / casts (hoisted out of the chunk loop).
    wcat = wcat_ref[...].astype(cdt)   # [D, 2D] = [Ws | Wr]
    wn_b = wn_b_ref[...]               # [1, D]
    se_w1 = se_w1_ref[...].astype(cdt)
    se_b1 = se_b1_ref[...]
    se_w2 = se_w2_ref[...].astype(cdt)
    se_b2 = se_b2_ref[...]
    v_w1 = v_w1_ref[...].astype(cdt)
    v_b1 = v_b1_ref[...]
    v_w2 = v_w2_ref[...]               # [1, H] stays f32 (VPU multiply path)
    v_b2 = v_b2_ref[...]               # [1, 1]

    def chunk(c):
        off = c * kc

        # ---- node2edge: project N node rows once, broadcast-add per edge ----
        node = node_ref[pl.ds(off, kc)]                       # [kc, N, D]
        node2 = node.reshape(kc * n, d).astype(cdt)           # [kc*N, D]
        proj = jnp.dot(node2, wcat,
                       preferred_element_type=jnp.float32)    # [kc*N, 2D]
        s_proj, r_proj = proj[:, :d], proj[:, d:]
        # pre[k, i*N + j] = Ws.node[k,i] + Wr.node[k,j] + b
        pre = (s_proj.reshape(kc, n, 1, d)
               + r_proj.reshape(kc, 1, n, d)
               + wn_b).reshape(rows_c, d)                     # [kc*E, D]
        edges_from_node = _gelu_exact(pre)

        # ---- LayerNorm(elementwise_affine=False) over the feature dim -------
        ei = edges_in_ref[pl.ds(off, kc)].reshape(rows_c, d)  # [kc*E, D]
        mean = jnp.mean(ei, axis=-1, keepdims=True)
        cent = ei - mean
        var = jnp.mean(cent * cent, axis=-1, keepdims=True)
        ei_norm = cent * jax.lax.rsqrt(var + _LN_EPS)

        # ---- edge_self_evolve: Linear(D, D//2) -> ReLU -> Linear(D//2, D) ---
        h = jnp.maximum(
            jnp.dot(ei_norm.astype(cdt), se_w1,
                    preferred_element_type=jnp.float32) + se_b1, 0.0)
        edges_self = (jnp.dot(h.astype(cdt), se_w2,
                              preferred_element_type=jnp.float32) + se_b2)

        # dropout(p=0.0) is the identity
        edges_z = edges_from_node + edges_self                # [kc*E, D]

        # ---- w_edge2value: Linear(D, D//2) -> ReLU -> Linear(D//2,1) -> ReLU
        hv = jnp.maximum(
            jnp.dot(edges_z.astype(cdt), v_w1,
                    preferred_element_type=jnp.float32) + v_b1, 0.0)
        # lane-dense value head: VPU multiply + lane reduce (no 1-column MXU op)
        hv3 = hv.reshape(kc, e, hv.shape[-1])                 # [kc, E, H]
        val = jnp.maximum(jnp.sum(hv3 * v_w2, axis=-1) + v_b2, 0.0)   # [kc, E]

        ez_ref[pl.ds(off, kc)] = edges_z.reshape(kc, e, d)
        val_ref[pl.ds(off, kc)] = val.reshape(kc, 1, e)

    if nchunks == 1:
        chunk(0)
    else:
        pl.loop(0, nchunks)(chunk)


def _choose_blocking(K, N, D, *, chunk_rows=2048, block_rows=8192,
                     vmem_budget=36 << 20):
    """Pick (kb = graphs per grid block, kc = graphs per in-kernel chunk).

    kc bounds the live elementwise/MLP temporaries (~chunk_rows edge rows);
    kb sizes the pipelined DMA blocks (~block_rows edge rows) so the ~0.35 us
    per-grid-step overhead is amortized, under a VMEM estimate (lane padding to
    128 included) that keeps double-buffered blocks + chunk temporaries within
    `vmem_budget` (v7x has only 64 MiB physical VMEM per core).  kb is capped
    at ceil(K/2) so the parallel grid keeps >= 2 steps for v7x's 2 TensorCores.
    """
    E = N * N
    H = max(D // 2, 1)
    pad = lambda x: -(-x // 128) * 128          # lane padding in VMEM
    row_b = pad(D) * 4                          # one f32 edge-feature row
    hrow_b = pad(H) * 4

    kc = max(1, min(K, chunk_rows // max(E, 1)))
    kb_cap = K if K < 2 else (K + 1) // 2
    kc = min(kc, kb_cap)

    def vmem_est(kb):
        # double-buffered pipelined blocks (in: node + edges, out: edges_z + val)
        blocks = 2 * (2 * kb * E * row_b + kb * N * row_b + kb * pad(E) * 4)
        # live per-chunk intermediates (gelu/LN/MLP temporaries, f32 + bf16)
        interm = (kc * E * (6 * row_b + 3 * hrow_b)
                  + kc * N * 3 * pad(2 * D) * 4)
        return blocks + interm + (2 << 20)      # weights + slack

    kb = kc
    while (kb + kc <= kb_cap and (kb + kc) * E <= block_rows
           and vmem_est(kb + kc) <= vmem_budget):
        kb += kc
    return kb, kc


def edge_nri_forward(node_inputs, edges_input, params, num_atoms,
                     *, chunk_rows=2048, block_rows=8192):
    """node_inputs: [K*N, D], edges_input: [K*N*N, D]
    -> (edges_z [K*N*N, D], edge_2_value [K, N*N])"""
    D = node_inputs.shape[1]
    N = num_atoms
    K = node_inputs.shape[0] // N
    E = N * N

    node = node_inputs.reshape(K, N, D)
    edges_in = edges_input.reshape(K, E, D)

    (wcat, wn_b, se_w1, se_b1, se_w2, se_b2,
     v_w1, v_b1, v_w2, v_b2) = params

    kb, kc = _choose_blocking(K, N, D, chunk_rows=chunk_rows,
                              block_rows=block_rows)
    G = (K + kb - 1) // kb
    K_pad = G * kb
    if K_pad != K:
        # Pad awkward K up to whole blocks instead of collapsing to tiny tiles.
        padn = K_pad - K
        node = jnp.pad(node, ((0, padn), (0, 0), (0, 0)))
        edges_in = jnp.pad(edges_in, ((0, padn), (0, 0), (0, 0)))

    kernel = functools.partial(edge_nri_kernel, kc=kc, nchunks=kb // kc)

    weight_args = (wcat, wn_b, se_w1, se_b1, se_w2, se_b2,
                   v_w1, v_b1, v_w2, v_b2)
    in_specs = ([pl.BlockSpec((kb, N, D), lambda g: (g, 0, 0)),
                 pl.BlockSpec((kb, E, D), lambda g: (g, 0, 0))]
                + [pl.BlockSpec(w.shape, lambda g: (0, 0))
                   for w in weight_args])

    ez3, val3 = pl.pallas_call(
        kernel,
        out_shape=[
            jax.ShapeDtypeStruct((K_pad, E, D), jnp.float32),
            jax.ShapeDtypeStruct((K_pad, 1, E), jnp.float32),  # E on lanes
        ],
        grid=(G,),
        in_specs=in_specs,
        out_specs=[
            pl.BlockSpec((kb, E, D), lambda g: (g, 0, 0)),
            pl.BlockSpec((kb, 1, E), lambda g: (g, 0, 0)),
        ],
        compiler_params=pltpu.CompilerParams(
            dimension_semantics=("parallel",),
            vmem_limit_bytes=48 * 1024 * 1024),
    )(node, edges_in, *weight_args)

    edges_z = ez3[:K].reshape(K * E, D)          # [K*N*N, D]
    edge_2_value = val3[:K].reshape(K, E)        # [K, N*N]
    return edges_z, edge_2_value


def init_params(key, D):
    """Deterministic synthetic init (normal*0.1 weights, zero biases),
    mirroring utils.init_network_weights.  Weights stored as [in, out]; the
    node2edge sender/receiver halves are packed into one [D, 2D] matrix and the
    value-head weight is a [1, H] lane-major row."""
    H = D // 2
    ks = jax.random.split(key, 5)
    std = 0.1
    wn_w = std * jax.random.normal(ks[0], (2 * D, D), jnp.float32)  # Linear(2D, D)
    wn_wcat = jnp.concatenate([wn_w[:D], wn_w[D:]], axis=1)         # [D, 2D]
    se_w1 = std * jax.random.normal(ks[1], (D, H), jnp.float32)
    se_w2 = std * jax.random.normal(ks[2], (H, D), jnp.float32)
    v_w1 = std * jax.random.normal(ks[3], (D, H), jnp.float32)
    v_w2 = std * jax.random.normal(ks[4], (1, H), jnp.float32)      # Linear(H, 1)
    wn_b = jnp.zeros((1, D), jnp.float32)
    se_b1 = jnp.zeros((1, H), jnp.float32)
    se_b2 = jnp.zeros((1, D), jnp.float32)
    v_b1 = jnp.zeros((1, H), jnp.float32)
    v_b2 = jnp.zeros((1, 1), jnp.float32)
    return (wn_wcat, wn_b, se_w1, se_b1, se_w2, se_b2,
            v_w1, v_b1, v_w2, v_b2)


def _reference(node_inputs, edges_input, params, num_atoms):
    """Pure-JAX reference matching the torch module (one-hot gathers, exact
    erf GELU)."""
    D = node_inputs.shape[1]
    N = num_atoms
    K = node_inputs.shape[0] // N
    E = N * N
    (wcat, wn_b, se_w1, se_b1, se_w2, se_b2,
     v_w1, v_b1, v_w2, v_b2) = params
    wn_ws, wn_wr = wcat[:, :D], wcat[:, D:]

    node = node_inputs.reshape(K, N, D)
    idx = jnp.arange(E)
    rel_send = jax.nn.one_hot(idx // N, N, dtype=jnp.float32)   # [E, N]
    rel_rec = jax.nn.one_hot(idx % N, N, dtype=jnp.float32)     # [E, N]
    senders = jnp.einsum('en,knd->ked', rel_send, node)
    receivers = jnp.einsum('en,knd->ked', rel_rec, node)
    pre = senders @ wn_ws + receivers @ wn_wr + wn_b
    edges_from_node = jax.nn.gelu(pre, approximate=False)

    ei = edges_input.reshape(K, E, D)
    mean = ei.mean(-1, keepdims=True)
    var = ((ei - mean) ** 2).mean(-1, keepdims=True)
    ei_norm = (ei - mean) / jnp.sqrt(var + _LN_EPS)

    h = jax.nn.relu(ei_norm @ se_w1 + se_b1)
    edges_self = h @ se_w2 + se_b2
    edges_z = edges_from_node + edges_self

    hv = jax.nn.relu(edges_z @ v_w1 + v_b1)
    val = jax.nn.relu(jnp.sum(hv * v_w2, axis=-1) + v_b2[0, 0])    # [K, E]
    return edges_z.reshape(-1, D), val


if __name__ == "__main__":
    def _check(K, N, D, seed, **blocking):
        key = jax.random.PRNGKey(seed)
        k_node, k_edge, k_par = jax.random.split(key, 3)
        node_inputs = jax.random.normal(k_node, (K * N, D), jnp.float32)
        edges_input = jax.random.normal(k_edge, (K * N * N, D), jnp.float32)
        params = init_params(k_par, D)

        edges_z, edge_2_value = edge_nri_forward(
            node_inputs, edges_input, params, N, **blocking)
        jax.block_until_ready((edges_z, edge_2_value))

        assert edges_z.shape == (K * N * N, D)
        assert edge_2_value.shape == (K, N * N)

        with jax.default_matmul_precision("float32"):
            ref_ez, ref_val = _reference(node_inputs, edges_input, params, N)
        # 2e-2 tolerance covers the bf16 MXU operands (f32 accumulation) and
        # the EUP approximate reciprocal inside the erf approximation.
        assert jnp.allclose(edges_z, ref_ez, atol=2e-2, rtol=2e-2), \
            float(jnp.max(jnp.abs(edges_z - ref_ez)))
        assert jnp.allclose(edge_2_value, ref_val, atol=2e-2, rtol=2e-2), \
            float(jnp.max(jnp.abs(edge_2_value - ref_val)))

    # Small shapes consistent with the module: K graphs, N atoms, D = in_channels.
    _check(K=2, N=4, D=32, seed=0)
    # Exercise the K-padding path (K=7 not a multiple of the block) and the
    # in-kernel chunk loop (4 chunks per block) with tiny block overrides.
    _check(K=7, N=4, D=32, seed=1, chunk_rows=16, block_rows=64)

    print("KERNEL_OK")
</pallas_src>

<mosaic_0001>
module attributes {stable_mosaic.version = 11 : i64} {
  func.func @edge_nri_kernel(%arg0: i32, %arg1: memref<1x4x32xf32, #tpu.memory_space<vmem>>, %arg2: memref<1x16x32xf32, #tpu.memory_space<vmem>>, %arg3: memref<32x64xf32, #tpu.memory_space<vmem>>, %arg4: memref<1x32xf32, #tpu.memory_space<vmem>>, %arg5: memref<32x16xf32, #tpu.memory_space<vmem>>, %arg6: memref<1x16xf32, #tpu.memory_space<vmem>>, %arg7: memref<16x32xf32, #tpu.memory_space<vmem>>, %arg8: memref<1x32xf32, #tpu.memory_space<vmem>>, %arg9: memref<32x16xf32, #tpu.memory_space<vmem>>, %arg10: memref<1x16xf32, #tpu.memory_space<vmem>>, %arg11: memref<1x16xf32, #tpu.memory_space<vmem>>, %arg12: memref<1x1xf32, #tpu.memory_space<vmem>>, %arg13: memref<1x16x32xf32, #tpu.memory_space<vmem>>, %arg14: memref<1x1x16xf32, #tpu.memory_space<vmem>>) attributes {dimension_semantics = [#tpu.dimension_semantics<parallel>], iteration_bounds = array<i64: 2>, scalar_prefetch = 0 : i64, scratch_operands = 0 : i64, tpu.core_type = #tpu.core_type<tc>, window_params = [{transform_indices = @transform_0, window_bounds = array<i64: 1, 4, 32>}, {transform_indices = @transform_1, window_bounds = array<i64: 1, 16, 32>}, {pipeline_mode = #tpu.pipeline_mode<synchronous>, transform_indices = @transform_2, window_bounds = array<i64: 32, 64>}, {pipeline_mode = #tpu.pipeline_mode<synchronous>, transform_indices = @transform_3, window_bounds = array<i64: 1, 32>}, {pipeline_mode = #tpu.pipeline_mode<synchronous>, transform_indices = @transform_4, window_bounds = array<i64: 32, 16>}, {pipeline_mode = #tpu.pipeline_mode<synchronous>, transform_indices = @transform_5, window_bounds = array<i64: 1, 16>}, {pipeline_mode = #tpu.pipeline_mode<synchronous>, transform_indices = @transform_6, window_bounds = array<i64: 16, 32>}, {pipeline_mode = #tpu.pipeline_mode<synchronous>, transform_indices = @transform_7, window_bounds = array<i64: 1, 32>}, {pipeline_mode = #tpu.pipeline_mode<synchronous>, transform_indices = @transform_8, window_bounds = array<i64: 32, 16>}, {pipeline_mode = #tpu.pipeline_mode<synchronous>, transform_indices = @transform_9, window_bounds = array<i64: 1, 16>}, {pipeline_mode = #tpu.pipeline_mode<synchronous>, transform_indices = @transform_10, window_bounds = array<i64: 1, 16>}, {pipeline_mode = #tpu.pipeline_mode<synchronous>, transform_indices = @transform_11, window_bounds = array<i64: 1, 1>}, {transform_indices = @transform_12, window_bounds = array<i64: 1, 16, 32>}, {transform_indices = @transform_13, window_bounds = array<i64: 1, 1, 16>}]} {
    %c0 = arith.constant 0 : index
    %c0_0 = arith.constant 0 : index
    %0 = vector.load %arg3[%c0, %c0_0] : memref<32x64xf32, #tpu.memory_space<vmem>>, vector<32x64xf32>
    %1 = arith.truncf %0 : vector<32x64xf32> to vector<32x64xbf16>
    %c0_1 = arith.constant 0 : index
    %c0_2 = arith.constant 0 : index
    %2 = vector.load %arg4[%c0_1, %c0_2] : memref<1x32xf32, #tpu.memory_space<vmem>>, vector<1x32xf32>
    %c0_3 = arith.constant 0 : index
    %c0_4 = arith.constant 0 : index
    %3 = vector.load %arg5[%c0_3, %c0_4] : memref<32x16xf32, #tpu.memory_space<vmem>>, vector<32x16xf32>
    %4 = arith.truncf %3 : vector<32x16xf32> to vector<32x16xbf16>
    %c0_5 = arith.constant 0 : index
    %c0_6 = arith.constant 0 : index
    %5 = vector.load %arg6[%c0_5, %c0_6] : memref<1x16xf32, #tpu.memory_space<vmem>>, vector<1x16xf32>
    %c0_7 = arith.constant 0 : index
    %c0_8 = arith.constant 0 : index
    %6 = vector.load %arg7[%c0_7, %c0_8] : memref<16x32xf32, #tpu.memory_space<vmem>>, vector<16x32xf32>
    %7 = arith.truncf %6 : vector<16x32xf32> to vector<16x32xbf16>
    %c0_9 = arith.constant 0 : index
    %c0_10 = arith.constant 0 : index
    %8 = vector.load %arg8[%c0_9, %c0_10] : memref<1x32xf32, #tpu.memory_space<vmem>>, vector<1x32xf32>
    %c0_11 = arith.constant 0 : index
    %c0_12 = arith.constant 0 : index
    %9 = vector.load %arg9[%c0_11, %c0_12] : memref<32x16xf32, #tpu.memory_space<vmem>>, vector<32x16xf32>
    %10 = arith.truncf %9 : vector<32x16xf32> to vector<32x16xbf16>
    %c0_13 = arith.constant 0 : index
    %c0_14 = arith.constant 0 : index
    %11 = vector.load %arg10[%c0_13, %c0_14] : memref<1x16xf32, #tpu.memory_space<vmem>>, vector<1x16xf32>
    %c0_15 = arith.constant 0 : index
    %c0_16 = arith.constant 0 : index
    %12 = vector.load %arg11[%c0_15, %c0_16] : memref<1x16xf32, #tpu.memory_space<vmem>>, vector<1x16xf32>
    %c0_17 = arith.constant 0 : index
    %c0_18 = arith.constant 0 : index
    %13 = vector.load %arg12[%c0_17, %c0_18] : memref<1x1xf32, #tpu.memory_space<vmem>>, vector<1x1xf32>
    %c0_19 = arith.constant 0 : index
    %c0_20 = arith.constant 0 : index
    %c0_21 = arith.constant 0 : index
    %14 = vector.load %arg1[%c0_19, %c0_20, %c0_21] : memref<1x4x32xf32, #tpu.memory_space<vmem>>, vector<1x4x32xf32>
    %15 = vector.shape_cast %14 : vector<1x4x32xf32> to vector<4x32xf32>
    %16 = arith.truncf %15 : vector<4x32xf32> to vector<4x32xbf16>
    %cst = arith.constant dense<0.000000e+00> : vector<4x64xf32>
    %17 = tpu.matmul %16, %1, %cst {dimension_numbers = #tpu.dot_dimension_numbers<[1], [0], [0], [1], [0, 0, 1, 1], [], []>} : vector<4x32xbf16>, vector<32x64xbf16>, vector<4x64xf32> -> vector<4x64xf32>
    %18 = vector.extract_strided_slice %17 {offsets = [0, 0], sizes = [4, 32], strides = [1, 1]} : vector<4x64xf32> to vector<4x32xf32>
    %19 = vector.extract_strided_slice %17 {offsets = [0, 32], sizes = [4, 32], strides = [1, 1]} : vector<4x64xf32> to vector<4x32xf32>
    %20 = vector.shape_cast %18 : vector<4x32xf32> to vector<1x4x1x32xf32>
    %21 = vector.shape_cast %19 : vector<4x32xf32> to vector<1x1x4x32xf32>
    %22 = vector.broadcast %20 : vector<1x4x1x32xf32> to vector<1x4x4x32xf32>
    %23 = vector.broadcast %21 : vector<1x1x4x32xf32> to vector<1x4x4x32xf32>
    %24 = arith.addf %22, %23 : vector<1x4x4x32xf32>
    %25 = vector.shape_cast %2 : vector<1x32xf32> to vector<1x1x1x32xf32>
    %26 = vector.broadcast %25 : vector<1x1x1x32xf32> to vector<1x4x4x32xf32>
    %27 = arith.addf %24, %26 : vector<1x4x4x32xf32>
    %28 = vector.shape_cast %27 : vector<1x4x4x32xf32> to vector<16x32xf32>
    %29 = math.absf %28 : vector<16x32xf32>
    %cst_22 = arith.constant 0.231641889 : f32
    %30 = vector.broadcast %cst_22 : f32 to vector<16x32xf32>
    %31 = arith.mulf %30, %29 : vector<16x32xf32>
    %cst_23 = arith.constant 1.000000e+00 : f32
    %32 = vector.broadcast %cst_23 : f32 to vector<16x32xf32>
    %33 = arith.addf %32, %31 : vector<16x32xf32>
    %34 = tpu.reciprocal %33 {approx = true} : vector<16x32xf32> -> vector<16x32xf32>
    %cst_24 = arith.constant 0.53070271 : f32
    %35 = vector.broadcast %cst_24 : f32 to vector<16x32xf32>
    %36 = arith.mulf %35, %34 : vector<16x32xf32>
    %cst_25 = arith.constant -0.72657603 : f32
    %37 = vector.broadcast %cst_25 : f32 to vector<16x32xf32>
    %38 = arith.addf %36, %37 : vector<16x32xf32>
    %39 = arith.mulf %38, %34 : vector<16x32xf32>
    %cst_26 = arith.constant 0.710706889 : f32
    %40 = vector.broadcast %cst_26 : f32 to vector<16x32xf32>
    %41 = arith.addf %39, %40 : vector<16x32xf32>
    %42 = arith.mulf %41, %34 : vector<16x32xf32>
    %cst_27 = arith.constant -0.142248362 : f32
    %43 = vector.broadcast %cst_27 : f32 to vector<16x32xf32>
    %44 = arith.addf %42, %43 : vector<16x32xf32>
    %45 = arith.mulf %44, %34 : vector<16x32xf32>
    %cst_28 = arith.constant 0.127414793 : f32
    %46 = vector.broadcast %cst_28 : f32 to vector<16x32xf32>
    %47 = arith.addf %45, %46 : vector<16x32xf32>
    %48 = arith.mulf %47, %34 : vector<16x32xf32>
    %cst_29 = arith.constant 0.000000e+00 : f32
    %49 = vector.broadcast %cst_29 : f32 to vector<16x32xf32>
    %50 = arith.maximumf %28, %49 : vector<16x32xf32>
    %51 = arith.mulf %29, %48 : vector<16x32xf32>
    %52 = arith.mulf %29, %29 : vector<16x32xf32>
    %cst_30 = arith.constant -5.000000e-01 : f32
    %53 = vector.broadcast %cst_30 : f32 to vector<16x32xf32>
    %54 = arith.mulf %53, %52 : vector<16x32xf32>
    %55 = math.exp %54 : vector<16x32xf32>
    %56 = arith.mulf %51, %55 : vector<16x32xf32>
    %57 = arith.subf %50, %56 : vector<16x32xf32>
    %c0_31 = arith.constant 0 : index
    %c0_32 = arith.constant 0 : index
    %c0_33 = arith.constant 0 : index
    %58 = vector.load %arg2[%c0_31, %c0_32, %c0_33] : memref<1x16x32xf32, #tpu.memory_space<vmem>>, vector<1x16x32xf32>
    %59 = vector.shape_cast %58 : vector<1x16x32xf32> to vector<16x32xf32>
    %cst_34 = arith.constant dense<0.000000e+00> : vector<16xf32>
    %60 = vector.multi_reduction <add>, %59, %cst_34 [1] : vector<16x32xf32> to vector<16xf32>
    %61 = vector.shape_cast %60 : vector<16xf32> to vector<16x1xf32>
    %cst_35 = arith.constant 3.200000e+01 : f32
    %62 = vector.broadcast %cst_35 : f32 to vector<16x1xf32>
    %63 = arith.divf %61, %62 : vector<16x1xf32>
    %64 = vector.broadcast %63 : vector<16x1xf32> to vector<16x32xf32>
    %65 = arith.subf %59, %64 : vector<16x32xf32>
    %66 = arith.mulf %65, %65 : vector<16x32xf32>
    %cst_36 = arith.constant dense<0.000000e+00> : vector<16xf32>
    %67 = vector.multi_reduction <add>, %66, %cst_36 [1] : vector<16x32xf32> to vector<16xf32>
    %68 = vector.shape_cast %67 : vector<16xf32> to vector<16x1xf32>
    %cst_37 = arith.constant 3.200000e+01 : f32
    %69 = vector.broadcast %cst_37 : f32 to vector<16x1xf32>
    %70 = arith.divf %68, %69 : vector<16x1xf32>
    %cst_38 = arith.constant 9.99999974E-6 : f32
    %71 = vector.broadcast %cst_38 : f32 to vector<16x1xf32>
    %72 = arith.addf %70, %71 : vector<16x1xf32>
    %73 = math.rsqrt %72 : vector<16x1xf32>
    %74 = vector.broadcast %73 : vector<16x1xf32> to vector<16x32xf32>
    %75 = arith.mulf %65, %74 : vector<16x32xf32>
    %76 = arith.truncf %75 : vector<16x32xf32> to vector<16x32xbf16>
    %cst_39 = arith.constant dense<0.000000e+00> : vector<16x16xf32>
    %77 = tpu.matmul %76, %4, %cst_39 {dimension_numbers = #tpu.dot_dimension_numbers<[1], [0], [0], [1], [0, 0, 1, 1], [], []>} : vector<16x32xbf16>, vector<32x16xbf16>, vector<16x16xf32> -> vector<16x16xf32>
    %78 = vector.broadcast %5 : vector<1x16xf32> to vector<16x16xf32>
    %79 = arith.addf %77, %78 : vector<16x16xf32>
    %cst_40 = arith.constant 0.000000e+00 : f32
    %80 = vector.broadcast %cst_40 : f32 to vector<16x16xf32>
    %81 = arith.maximumf %79, %80 : vector<16x16xf32>
    %82 = arith.truncf %81 : vector<16x16xf32> to vector<16x16xbf16>
    %cst_41 = arith.constant dense<0.000000e+00> : vector<16x32xf32>
    %83 = tpu.matmul %82, %7, %cst_41 {dimension_numbers = #tpu.dot_dimension_numbers<[1], [0], [0], [1], [0, 0, 1, 1], [], []>} : vector<16x16xbf16>, vector<16x32xbf16>, vector<16x32xf32> -> vector<16x32xf32>
    %84 = vector.broadcast %8 : vector<1x32xf32> to vector<16x32xf32>
    %85 = arith.addf %83, %84 : vector<16x32xf32>
    %86 = arith.addf %57, %85 : vector<16x32xf32>
    %87 = arith.truncf %86 : vector<16x32xf32> to vector<16x32xbf16>
    %cst_42 = arith.constant dense<0.000000e+00> : vector<16x16xf32>
    %88 = tpu.matmul %87, %10, %cst_42 {dimension_numbers = #tpu.dot_dimension_numbers<[1], [0], [0], [1], [0, 0, 1, 1], [], []>} : vector<16x32xbf16>, vector<32x16xbf16>, vector<16x16xf32> -> vector<16x16xf32>
    %89 = vector.broadcast %11 : vector<1x16xf32> to vector<16x16xf32>
    %90 = arith.addf %88, %89 : vector<16x16xf32>
    %cst_43 = arith.constant 0.000000e+00 : f32
    %91 = vector.broadcast %cst_43 : f32 to vector<16x16xf32>
    %92 = arith.maximumf %90, %91 : vector<16x16xf32>
    %93 = vector.shape_cast %92 : vector<16x16xf32> to vector<1x16x16xf32>
    %94 = vector.shape_cast %12 : vector<1x16xf32> to vector<1x1x16xf32>
    %95 = vector.broadcast %94 : vector<1x1x16xf32> to vector<1x16x16xf32>
    %96 = arith.mulf %93, %95 : vector<1x16x16xf32>
    %cst_44 = arith.constant dense<0.000000e+00> : vector<1x16xf32>
    %97 = vector.multi_reduction <add>, %96, %cst_44 [2] : vector<1x16x16xf32> to vector<1x16xf32>
    %98 = vector.broadcast %13 : vector<1x1xf32> to vector<1x16xf32>
    %99 = arith.addf %97, %98 : vector<1x16xf32>
    %cst_45 = arith.constant 0.000000e+00 : f32
    %100 = vector.broadcast %cst_45 : f32 to vector<1x16xf32>
    %101 = arith.maximumf %99, %100 : vector<1x16xf32>
    %102 = vector.shape_cast %86 : vector<16x32xf32> to vector<1x16x32xf32>
    %c0_46 = arith.constant 0 : index
    %c0_47 = arith.constant 0 : index
    %c0_48 = arith.constant 0 : index
    %103 = vector.load %arg13[%c0_46, %c0_47, %c0_48] : memref<1x16x32xf32, #tpu.memory_space<vmem>>, vector<1x16x32xf32>
    tpu.vector_store %arg13[%c0_46, %c0_47, %c0_48], %102 {strides = array<i32>} : memref<1x16x32xf32, #tpu.memory_space<vmem>>, vector<1x16x32xf32>,
    %104 = vector.shape_cast %101 : vector<1x16xf32> to vector<1x1x16xf32>
    %c0_49 = arith.constant 0 : index
    %c0_50 = arith.constant 0 : index
    %c0_51 = arith.constant 0 : index
    %105 = vector.load %arg14[%c0_49, %c0_50, %c0_51] : memref<1x1x16xf32, #tpu.memory_space<vmem>>, vector<1x1x16xf32>
    tpu.vector_store %arg14[%c0_49, %c0_50, %c0_51], %104 {strides = array<i32>} : memref<1x1x16xf32, #tpu.memory_space<vmem>>, vector<1x1x16xf32>,
    return
  }
  func.func @transform_0(%arg0: i32) -> (i32, i32, i32) {
    %c0_i32 = arith.constant 0 : i32
    %c0_i32_0 = arith.constant 0 : i32
    %c0_i32_1 = arith.constant 0 : i32
    return %arg0, %c0_i32, %c0_i32_0 : i32, i32, i32
  }
  func.func @transform_1(%arg0: i32) -> (i32, i32, i32) {
    %c0_i32 = arith.constant 0 : i32
    %c0_i32_0 = arith.constant 0 : i32
    %c0_i32_1 = arith.constant 0 : i32
    return %arg0, %c0_i32, %c0_i32_0 : i32, i32, i32
  }
  func.func @transform_2(%arg0: i32) -> (i32, i32) {
    %c0_i32 = arith.constant 0 : i32
    %c0_i32_0 = arith.constant 0 : i32
    %c0_i32_1 = arith.constant 0 : i32
    return %c0_i32, %c0_i32_0 : i32, i32
  }
  func.func @transform_3(%arg0: i32) -> (i32, i32) {
    %c0_i32 = arith.constant 0 : i32
    %c0_i32_0 = arith.constant 0 : i32
    %c0_i32_1 = arith.constant 0 : i32
    return %c0_i32, %c0_i32_0 : i32, i32
  }
  func.func @transform_4(%arg0: i32) -> (i32, i32) {
    %c0_i32 = arith.constant 0 : i32
    %c0_i32_0 = arith.constant 0 : i32
    %c0_i32_1 = arith.constant 0 : i32
    return %c0_i32, %c0_i32_0 : i32, i32
  }
  func.func @transform_5(%arg0: i32) -> (i32, i32) {
    %c0_i32 = arith.constant 0 : i32
    %c0_i32_0 = arith.constant 0 : i32
    %c0_i32_1 = arith.constant 0 : i32
    return %c0_i32, %c0_i32_0 : i32, i32
  }
  func.func @transform_6(%arg0: i32) -> (i32, i32) {
    %c0_i32 = arith.constant 0 : i32
    %c0_i32_0 = arith.constant 0 : i32
    %c0_i32_1 = arith.constant 0 : i32
    return %c0_i32, %c0_i32_0 : i32, i32
  }
  func.func @transform_7(%arg0: i32) -> (i32, i32) {
    %c0_i32 = arith.constant 0 : i32
    %c0_i32_0 = arith.constant 0 : i32
    %c0_i32_1 = arith.constant 0 : i32
    return %c0_i32, %c0_i32_0 : i32, i32
  }
  func.func @transform_8(%arg0: i32) -> (i32, i32) {
    %c0_i32 = arith.constant 0 : i32
    %c0_i32_0 = arith.constant 0 : i32
    %c0_i32_1 = arith.constant 0 : i32
    return %c0_i32, %c0_i32_0 : i32, i32
  }
  func.func @transform_9(%arg0: i32) -> (i32, i32) {
    %c0_i32 = arith.constant 0 : i32
    %c0_i32_0 = arith.constant 0 : i32
    %c0_i32_1 = arith.constant 0 : i32
    return %c0_i32, %c0_i32_0 : i32, i32
  }
  func.func @transform_10(%arg0: i32) -> (i32, i32) {
    %c0_i32 = arith.constant 0 : i32
    %c0_i32_0 = arith.constant 0 : i32
    %c0_i32_1 = arith.constant 0 : i32
    return %c0_i32, %c0_i32_0 : i32, i32
  }
  func.func @transform_11(%arg0: i32) -> (i32, i32) {
    %c0_i32 = arith.constant 0 : i32
    %c0_i32_0 = arith.constant 0 : i32
    %c0_i32_1 = arith.constant 0 : i32
    return %c0_i32, %c0_i32_0 : i32, i32
  }
  func.func @transform_12(%arg0: i32) -> (i32, i32, i32) {
    %c0_i32 = arith.constant 0 : i32
    %c0_i32_0 = arith.constant 0 : i32
    %c0_i32_1 = arith.constant 0 : i32
    return %arg0, %c0_i32, %c0_i32_0 : i32, i32, i32
  }
  func.func @transform_13(%arg0: i32) -> (i32, i32, i32) {
    %c0_i32 = arith.constant 0 : i32
    %c0_i32_0 = arith.constant 0 : i32
    %c0_i32_1 = arith.constant 0 : i32
    return %arg0, %c0_i32, %c0_i32_0 : i32, i32, i32
  }
}

</mosaic_0001>

<bundles_post_ra>
// kernel: tpu_custom_call.1
= control target key start
LH: loop header
LB: loop body
LE: loop exit
PB: predicated region body
PF: predicated region fallthrough
CT: control target
= control target key end

     0   :  { %s1571_s0 = inlined_call_operand.hbm [shape: f32[2,4,32], index: 0, kind: input, shape index: {}]   ;;  %s1572_s1 = inlined_call_operand.vmem [shape: f32[2,16,32], index: 1, kind: input, shape index: {}]   ;;  %s1573_s2 = inlined_call_operand.vmem [shape: f32[32,64], index: 2, kind: input, shape index: {}]   ;;  %s1574_s3 = inlined_call_operand.vmem [shape: f32[1,32], index: 3, kind: input, shape index: {}]   ;;  %s1575_s4 = inlined_call_operand.vmem [shape: f32[32,16], index: 4, kind: input, shape index: {}]   ;;  %s1576_s5 = inlined_call_operand.vmem [shape: f32[1,16], index: 5, kind: input, shape index: {}]   ;;  %s1577_s6 = inlined_call_operand.vmem [shape: f32[16,32], index: 6, kind: input, shape index: {}]   ;;  %s1578_s7 = inlined_call_operand.vmem [shape: f32[1,32], index: 7, kind: input, shape index: {}]   ;;  %s1579_s8 = inlined_call_operand.vmem [shape: f32[32,16], index: 8, kind: input, shape index: {}]   ;;  %s1580_s9 = inlined_call_operand.vmem [shape: f32[1,16], index: 9, kind: input, shape index: {}]   ;;  %s1581_s10 = inlined_call_operand.vmem [shape: f32[1,16], index: 10, kind: input, shape index: {}]   ;;  %s1582_s11 = inlined_call_operand.<no memory space> [shape: f32[1,1], index: 11, kind: input, shape index: {}]   ;;  %s1583_s12 = inlined_call_operand.hbm [shape: f32[2,16,32], index: 12, kind: output, shape index: {0}]   ;;  %s1584_s13 = inlined_call_operand.hbm [shape: f32[2,1,16], index: 13, kind: output, shape index: {1}]  }
   0x1   :  { %1591 = sst [smem:[#allocation17_spill]] %s1584_s13  ;;  %v19_v0 = vstv %s1582_s11 }
   0x2   :  { %20 = vst [vmem:[#allocation2] sm:$0x1] %v19_v0 }
   0x3   :  { %21 = vsyncpa [#allocation4], 0 }
   0x4   :  { %23 = vsyncpa [#allocation4 + $0x1], 0 }
   0x5   :  { %24 = vsyncpa [#allocation5], 0 }
   0x6   :  { %26 = vsyncpa [#allocation5 + $0x1], 0 }
   0x7   :  { %27 = vsyncpa [#allocation8], 0 }
   0x8   :  { %29 = vsyncpa [#allocation8 + $0x1], 0  ;;  %s1299_s27 = smov 0   ;;  %s1301_s28 = smov 0  }
   0x9   :  { %s1303_s29 = smov 0   ;;  %s1305_s30 = smov 0  }
   0xa LB: > { %1592 = sst [smem:[#allocation12_spill]] %s1207_s27  ;;  %s1320_s11 = sadd.s32 4294967295, %s1219_s30   ;;  %s1219_s30 = sphi %s1305_s30, %s1606_s30   ;;  %s1215_s29 = sphi %s1303_s29, %s1611_s29   ;;  %s1211_s28 = sphi %s1301_s28, %s1610_s28   ;;  %s1207_s27 = sphi %s1299_s27, %s1609_s27  }
   0xb   : > { %1593 = sst [smem:[#allocation13_spill]] %s1215_s29  ;;  %s985_s14 = sadd.s32 4294967294, %s1219_s30  }
   0xc   : > { %s1324_s15 = sadd.s32 1, %s1219_s30   ;;  %s42_s16 = sadd.s32 1, %s1215_s29 }
   0xd   : > { %1594 = sst [smem:[#allocation14_spill]] %s1324_s15  ;;  %s39_s17 = ssub.s32 %s1219_s30, %s1324_s15 }
   0xe   : > { %p49_p0 = scmp.ne.s32.totalorder %s1215_s29, %s1211_s28  ;;  %p40_p1 = scmp.eq.s32.totalorder %s39_s17, 0 }
   0xf   : > { %p50_p2 = scmp.eq.s32.totalorder %s1219_s30, 0  ;;  %p55_p3 = scmp.ne.s32.totalorder %s1211_s28, %s1207_s27 }
  0x10   : > { %p56_p4 = scmp.eq.s32.totalorder %s1320_s11, 0  ;;  %p315_p7 = scmp.eq.s32.totalorder %s1320_s11, 1 }
  0x11   : > { %s1336_s18 = scalar_select %p40_p1, %s1215_s29, %s42_s16  }
  0x12   : > { %p1338_p5 = por %p50_p2, %p49_p0  ;;  %p1342_p6 = por %p56_p4, %p55_p3 }
  0x13   : > { %1595 = sst [smem:[#allocation15_spill]] %s1336_s18  ;;  %p321_p8 = scmp.eq.s32.totalorder %s985_s14, 1 }
  0x14   : > { %p1023_p10 = scmp.lt.s32.totalorder %s1219_s30, 2  ;;  %p1349_p11 = por %p315_p7, %p49_p0 }
  0x15   : > { %p1353_p12 = por %p321_p8, %p55_p3  ;;  %s397_s23 = sand.u32 1, %s1215_s29  }
  0x16   : > { %s989_s24 = sshll.u32 %s1219_s30, 2  ;;  %s988_s25 = sshll.u32 %s397_s23, 2 }
  0x17   : > { %s1599_s22 = scalar_select %p1353_p12, 1, 0 }
  0x18   : > { %s405_s17 = scalar_lea.hbm %s1571_s0, %s989_s24  ;;  %s401_s14 = scalar_lea.vmem [#allocation3], %s988_s25 }
  0x19   : > { %1600 = sst [smem:[#allocation16_spill]] %s1599_s22  ;;  %s407_s18 = sshll.u32 %s405_s17, 4  ;;  %s408_s18 = int_to_ptr.hbm [resolvable:$true] %s407_s18 }
  0x1a   : > { %s409_s15 = sshll.u32 %s401_s14, 4  ;;  %p1364_p13 = pnand %p1023_p10, %p1338_p5  ;;  %s410_s15 = int_to_ptr.vmem [resolvable:$true] %s409_s15 }
  0x1b   : > { %p990_p0 = scmp.ge.s32.totalorder %s1219_s30, 1  ;;  %p422_p1 = scmp.lt.s32.totalorder %s1219_s30, 3 }
  0x1c   : > { %s398_s29 = scalar_lea.sflag [#allocation4], %s397_s23  ;;  %s1091_s22 = sshra.s32 %s408_s18, 4  ;;  %s1092_s22 = int_to_ptr.hbm [resolvable:$true] %s1091_s22 }
  0x1d   : > { %s1093_s13 = scalar_lea.hbm %s1092_s22, 4  ;;  %p1095_p3 = pneg %p1364_p13 }
  0x1e   : > { %p1094_p2 = scmp.ne.s32.totalorder %s1092_s22, %s1093_s13  ;;  %s1098_s19 = scalar_lea.hbm %s1571_s0, 8 }
  0x1f   : > { %p1099_p5 = scmp.lt.s32.totalorder %s1092_s22, %s1571_s0  ;;  %p1100_p8 = scmp.lt.s32.totalorder %s1098_s19, %s1093_s13 }
  0x20   : > { %p1096_p4 = pnand %p1095_p3, %p1094_p2 }
  0x21   : > { %p1101_p10 = por %p1100_p8, %p1099_p5 }
  0x22   : > { %p1097_p7 = pneg %p1096_p4 }
  0x24   : > { %p1102_p9 = pnand %p1101_p10, %p1097_p7 }
  0x26   : > { %1105 = shalt.err (!%p1102_p9)
}
  0x27   : > { %1015 = dma.hbm_to_vmem [thread:$0]  (!%p1364_p13), %s408_s18, 64, %s410_s15, %s398_s29  }
  0x28   : > { %p423_p2 = pnand %p990_p0, %p422_p1 }
  0x29   : > { %s1385_s23 = sand.u32 (!%p423_p2), 1, %s1211_s28  }
  0x2a   : > { %426 = sbr.rel (%p423_p2) target bundleno = 899 (0x383), region = 68  ;;  %s991_s22 = sshll.u32 (!%p423_p2), %s1385_s23, 2 }
  0x2b   : > { %s429_s13 = scalar_lea.sflag (!%p423_p2), [#allocation4], %s1385_s23  ;;  %s432_s17 = scalar_lea.vmem (!%p423_p2), [#allocation3], %s991_s22 }
  0x2f   : > { %1194 = dma.done.wait (%p1342_p6), %s429_s13, 64  }
  0x30   : > { %1196 = vsyncadd (%p1342_p6), %s429_s13, 4294967232  ;;  %p485_p9 = scmp.lt.s32.totalorder %s1320_s11, 1  ;;  %vm520_vm0 = vcmask 261120   ;;  %v1221_v5 = vmov 32.0   ;;  %v493_v8 = vld [vmem:[%s1573_s2 + $0x10] sm:$0xff]  ;;  %v494_v9 = vld [vmem:[%s1573_s2 + $0x18] sm:$0xff] }
  0x31   : > { %1069 = vrcp.f32 %v1221_v5  ;;  %v491_v10 = vld [vmem:[%s1573_s2] sm:$0xff]  ;;  %v496_v11 = vpack.c.bf16 %v494_v9, %v493_v8  ;;  %v492_v12 = vld [vmem:[%s1573_s2 + $0x8] sm:$0xff]  ;;  %v500_v30 = vld [vmem:[%s1575_s4 + $0x10] sm:$0xff]  ;;  %s1222_s25 = smov 96   ;;  %vm727_vm8 = vcmask 130048   ;;  %s992_s13 = sshll.u32 %s1385_s23, 4 }
  0x32   : > { %s486_s27 = scalar_select %p485_p9, %s1320_s11, 1  ;;  %v495_v14 = vpack.c.bf16 %v492_v12, %v491_v10  ;;  %v518_v15 = vld [vmem:[%s432_s17] sm:$0xf]  ;;  %v501_v31 = vld [vmem:[%s1575_s4 + $0x18] sm:$0xff]  ;;  %v498_v33 = vld [vmem:[%s1575_s4] sm:$0xff] }
  0x33   : > { %530 = vmatpush.bf16.msra.mxu0 %v496_v11  ;;  %v519_v17 = vpack.c.bf16 %v518_v15, %v518_v15  ;;  %v503_v32 = vpack.c.bf16 %v501_v31, %v500_v30  ;;  %v499_v34 = vld [vmem:[%s1575_s4 + $0x8] sm:$0xff]  ;;  %v505_v61 = vld [vmem:[%s1577_s6] sm:$0xff]  ;;  %s478_s17 = scalar_lea.vmem [#allocation6], %s992_s13  ;;  %s840_s16 = scalar_lea.sflag [#allocation5], %s1385_s23 }
  0x34   : > { %s1004_s29 = sshll.u32 %s486_s27, 4  ;;  %v502_v35 = vpack.c.bf16 %v499_v34, %v498_v33  ;;  %v506_v62 = vld [vmem:[%s1577_s6 + $0x8] sm:$0xff]  ;;  %v1064_v12 = vld [vmem:[%s1574_s3] ss:$0 sm:$0xff]  ;;  %s856_s19 = sshll.u32 %s478_s17, 4  ;;  %s857_s19 = int_to_ptr.vmem [resolvable:$true] %s856_s19 }
  0x35   : > { %s489_s14 = scalar_lea.vmem %s1572_s1, %s1004_s29  ;;  %713 = vmatpush.bf16.msra.mxu1 %v503_v32  ;;  %v507_v63 = vpack.c.bf16 %v506_v62, %v505_v61  ;;  %s1141_s15 = scalar_lea.hbm %s1583_s12, 32 }
  0x36   : > { %v647_v1 = vld [vmem:[%s489_s14] sm:$0xff]  ;;  %v648_v3 = vld [vmem:[%s489_s14 + $0x8] sm:$0xff]  ;;  %s1005_s14 = sshll.u32 %s1320_s11, 4 }
  0x37   : > { %v649_v2 = vsel %vm520_vm0, %v647_v1, 0.0  ;;  %v652_v4 = vsel %vm520_vm0, %v648_v3, 0.0  ;;  %v1070_v6 = vpop.eup %1069  ;;  %531 = vmatpush.bf16.msra.mxu0 %v495_v14  ;;  %738 = vmatpush.bf16.msra.mxu2 %v507_v63 }
  0x38   : > { %650 = vadd.xlane.f32.xlu0 %v649_v2  ;;  %v656_v7 = vmul.f32 32.0, %v1070_v6  ;;  %vm660_vm1 = vweird.f32 %v1070_v6 }
  0x39   : > { %714 = vmatpush.bf16.msra.mxu1 %v502_v35 }
  0x3a   : > { %v657_v13 = vsub.f32 1.0, %v656_v7  ;;  %995 = vmatmul.msk.bf16.vlgmr.msra.gmra.mxu0 %vm520_vm0, %v519_v17 }
  0x3c   : > { %v658_v16 = vmul.f32 %v1070_v6, %v657_v13 }
  0x3e   : > { %v659_v18 = vadd.f32 %v1070_v6, %v658_v16 }
  0x40   : > { %653 = vadd.xlane.f32.xlu0 %v652_v4  ;;  %v661_v19 = vsel %vm660_vm1, %v1070_v6, %v659_v18 }
  0xab   : > { %v651_v20 = vpop.xlane.xlu0 %650 }
  0xac   : > { %v662_v21 = vmul.f32 %v661_v19, %v651_v20 }
  0xae   : > { %v664_v22 = vsub.f32 %v647_v1, %v662_v21  ;;  %v1065_v1 = vld [vmem:[%s1576_s5] ss:$0 sm:$0xff] }
  0xb0   : > { %v666_v23 = vmul.f32 %v664_v22, %v664_v22 }
  0xb2   : > { %v668_v24 = vsel %vm520_vm0, %v666_v23, 0.0 }
  0xb3   : > { %669 = vadd.xlane.f32.xlu1 %v668_v24  ;;  %v654_v25 = vpop.xlane.xlu0 %653 }
  0xb4   : > { %v663_v26 = vmul.f32 %v661_v19, %v654_v25 }
  0xb6   : > { %v665_v27 = vsub.f32 %v648_v3, %v663_v26 }
  0xb7   : > { %v533_v39 = vpop.f32.mrf.mxu0 }
  0xb8   : > { %v667_v28 = vmul.f32 %v665_v27, %v665_v27  ;;  %549 = vrot.lane.b32.xlu2 %v533_v39, %s1222_s25  ;;  %v538_v8 = vrot.slane %v533_v39, 1  ;;  %v541_v9 = vperm.slane %v533_v39, 0  ;;  %v539_v13 = vrot.slane %v533_v39, 2  ;;  %s855_s25 = scalar_lea.hbm %s1583_s12, %s1005_s14 }
  0xb9   : > { %v540_v15 = vrot.slane %v533_v39, 3  ;;  %s858_s26 = sshll.u32 %s855_s25, 4  ;;  %s859_s26 = int_to_ptr.hbm [resolvable:$true] %s858_s26 }
  0xba   : > { %v671_v29 = vsel %vm520_vm0, %v667_v28, 0.0  ;;  %v542_v11 = vperm.slane %v538_v8, 0  ;;  %v543_v17 = vperm.slane %v539_v13, 0  ;;  %s1135_s22 = sshra.s32 %s859_s26, 4  ;;  %s1136_s22 = int_to_ptr.hbm [resolvable:$true] %s1135_s22 }
  0xbb   : > { %672 = vadd.xlane.f32.xlu1 %v671_v29  ;;  %s1137_s13 = scalar_lea.hbm %s1136_s22, 16  ;;  %p1142_p1 = scmp.lt.s32.totalorder %s1136_s22, %s1583_s12 }
  0xbc   : > { %p1138_p6 = scmp.ne.s32.totalorder %s1136_s22, %s1137_s13  ;;  %p1143_p3 = scmp.lt.s32.totalorder %s1141_s15, %s1137_s13 }
  0xbe   : > { %p1139_p13 = pnand %p1138_p6, %p1349_p11  ;;  %p1144_p4 = por %p1143_p3, %p1142_p1 }
  0xbf   : > { %v535_v44 = vpop.f32.mrf.mxu0 }
  0xc0   : > { %p1140_p0 = pneg %p1139_p13 }
  0xc2   : > { %p1145_p7 = pnand %p1144_p4, %p1140_p0 }
 0x112   : > { %v550_v10 = vpop.permute.xlu2 %549 }
 0x113   : > { %v552_v14 = vadd.f32 %v550_v10, %v541_v9  ;;  %v553_v16 = vadd.f32 %v550_v10, %v542_v11  ;;  %v554_v21 = vadd.f32 %v550_v10, %v543_v17  ;;  %v510_v11 = vld [vmem:[%s1579_s8 + $0x8] sm:$0xff] }
 0x115   : > { %v1441_v18 = vadd.f32 %v1064_v12, %v552_v14  ;;  %v1443_v20 = vadd.f32 %v1064_v12, %v553_v16  ;;  %v1451_v25 = vadd.f32 %v1064_v12, %v554_v21 }
 0x117   : > { %v1449_v24 = vand.u32 2147483647, %v1443_v20  ;;  %v1458_v29 = vand.u32 2147483647, %v1451_v25 }
 0x119   : > { %v568_v28 = vmul.f32 0.23164189, %v1449_v24  ;;  %v569_v33 = vmul.f32 0.23164189, %v1458_v29  ;;  %v625_v8 = vmul.f32 %v1458_v29, %v1458_v29 }
 0x11b   : > { %v572_v32 = vadd.f32 1.0, %v568_v28  ;;  %v573_v35 = vadd.f32 1.0, %v569_v33  ;;  %v629_v21 = vmul.f32 -0.5, %v625_v8  ;;  %v1068_v8 = vld [vmem:[%s1581_s10] ss:$0 sm:$0xff] }
 0x11d   : > { %v635_v33 = vmul.f32 1.442695, %v629_v21 }
 0x126   : > { %v670_v36 = vpop.xlane.xlu1 %669 }
 0x127   : > { %v674_v37 = vmul.f32 %v670_v36, %v661_v19 }
 0x129   : > { %v676_v38 = vadd.f32 1e-05, %v674_v37 }
 0x12b   : > { %1071 = vrsqrt.f32 %v676_v38  ;;  %vm684_vm3 = vweird.f32 %v676_v38 }
 0x12e   : > { %v673_v40 = vpop.xlane.xlu1 %672 }
 0x12f   : > { %v675_v41 = vmul.f32 %v673_v40, %v661_v19  ;;  %v544_v19 = vperm.slane %v540_v15, 0 }
 0x131   : > { %v1072_v42 = vpop.eup %1071  ;;  %v677_v43 = vadd.f32 1e-05, %v675_v41  ;;  %v555_v23 = vadd.f32 %v550_v10, %v544_v19 }
 0x132   : > { %v679_v45 = vmul.f32 %v1072_v42, %v676_v38  ;;  %vm685_vm2 = vweird.f32 %v1072_v42 }
 0x133   : > { %1073 = vrsqrt.f32 %v677_v43  ;;  %vm686_vm5 = vmor %vm684_vm3, %vm685_vm2  ;;  %vm694_vm6 = vweird.f32 %v677_v43 }
 0x134   : > { %v680_v46 = vmul.f32 %v1072_v42, %v679_v45 }
 0x136   : > { %v681_v47 = vmul.f32 0.5, %v680_v46 }
 0x138   : > { %v682_v49 = vsub.f32 1.5, %v681_v47 }
 0x139   : > { %v1074_v48 = vpop.eup %1073 }
 0x13a   : > { %v689_v50 = vmul.f32 %v1074_v48, %v677_v43  ;;  %v683_v52 = vmul.f32 %v1072_v42, %v682_v49  ;;  %vm695_vm4 = vweird.f32 %v1074_v48 }
 0x13b   : > { %vm696_vm7 = vmor %vm694_vm6, %vm695_vm4 }
 0x13c   : > { %v690_v51 = vmul.f32 %v1074_v48, %v689_v50  ;;  %v687_v56 = vsel %vm686_vm5, %v1072_v42, %v683_v52 }
 0x13d   : > { %v698_v58 = vmul.f32 %v687_v56, %v664_v22  ;;  %v1446_v22 = vand.u32 2147483647, %v1441_v18 }
 0x13e   : > { %v691_v53 = vmul.f32 0.5, %v690_v51 }
 0x13f   : > { %v567_v26 = vmul.f32 0.23164189, %v1446_v22 }
 0x140   : > { %v692_v54 = vsub.f32 1.5, %v691_v53 }
 0x141   : > { %v571_v30 = vadd.f32 1.0, %v567_v26 }
 0x142   : > { %v693_v55 = vmul.f32 %v1074_v48, %v692_v54 }
 0x143   : > { %1075 = vrcp.f32 %v571_v30 }
 0x144   : > { %v697_v57 = vsel %vm696_vm7, %v1074_v48, %v693_v55  ;;  %1077 = vrcp.f32 %v572_v32 }
 0x145   : > { %v699_v59 = vmul.f32 %v697_v57, %v665_v27  ;;  %v1454_v27 = vadd.f32 %v1064_v12, %v555_v23  ;;  %1079 = vrcp.f32 %v573_v35  ;;  %v623_v57 = vmul.f32 %v1446_v22, %v1446_v22 }
 0x147   : > { %v700_v60 = vpack.c.bf16 %v699_v59, %v698_v58  ;;  %v1461_v31 = vand.u32 2147483647, %v1454_v27  ;;  %v627_v63 = vmul.f32 -0.5, %v623_v57 }
 0x149   : > { %996 = vmatmul.msk.bf16.vlgmr.msra.gmra.mxu1 %vm520_vm0, %v700_v60  ;;  %v570_v34 = vmul.f32 0.23164189, %v1461_v31  ;;  %v1076_v36 = vpop.eup %1075  ;;  %v624_v60 = vmul.f32 %v1449_v24, %v1449_v24  ;;  %v631_v9 = vmul.f32 1.442695, %v627_v63  ;;  %v626_v14 = vmul.f32 %v1461_v31, %v1461_v31 }
 0x14a   : > { %v1078_v38 = vpop.eup %1077  ;;  %v579_v39 = vmul.f32 0.5307027, %v1076_v36 }
 0x14b   : > { %v574_v37 = vadd.f32 1.0, %v570_v34  ;;  %v580_v40 = vmul.f32 0.5307027, %v1078_v38  ;;  %v1465_v42 = vpop.eup %1079  ;;  %v630_v28 = vmul.f32 -0.5, %v626_v14 }
 0x14c   : > { %v583_v41 = vadd.f32 -0.72657603, %v579_v39  ;;  %v581_v46 = vmul.f32 0.5307027, %v1465_v42 }
 0x14d   : > { %1081 = vrcp.f32 %v574_v37  ;;  %v584_v43 = vadd.f32 -0.72657603, %v580_v40  ;;  %v637_v39 = vmul.f32 1.442695, %v630_v28 }
 0x14e   : > { %v587_v45 = vmul.f32 %v1076_v36, %v583_v41  ;;  %v585_v50 = vadd.f32 -0.72657603, %v581_v46  ;;  %1083 = vpow2.f32 %v631_v9 }
 0x14f   : > { %v588_v47 = vmul.f32 %v1078_v38, %v584_v43 }
 0x150   : > { %v591_v49 = vadd.f32 0.7107069, %v587_v45  ;;  %v589_v54 = vmul.f32 %v1465_v42, %v585_v50 }
 0x151   : > { %v592_v51 = vadd.f32 0.7107069, %v588_v47 }
 0x152   : > { %v595_v53 = vmul.f32 %v1076_v36, %v591_v49  ;;  %v593_v59 = vadd.f32 0.7107069, %v589_v54 }
 0x153   : > { %v1467_v44 = vpop.eup %1081  ;;  %v596_v55 = vmul.f32 %v1078_v38, %v592_v51 }
 0x154   : > { %v582_v48 = vmul.f32 0.5307027, %v1467_v44  ;;  %v599_v58 = vadd.f32 -0.14224836, %v595_v53  ;;  %v1084_v37 = vpop.eup %1083 }
 0x155   : > { %v600_v61 = vadd.f32 -0.14224836, %v596_v55 }
 0x156   : > { %v586_v52 = vadd.f32 -0.72657603, %v582_v48 }
 0x158   : > { %v590_v56 = vmul.f32 %v1467_v44, %v586_v52 }
 0x15a   : > { %v594_v62 = vadd.f32 0.7107069, %v590_v56 }
 0x1c6   : > { %v716_v0 = vpop.f32.mrf.mxu1 }
 0x1c7   : > { %v717_v2 = vadd.f32 %v1065_v1, %v716_v0  ;;  %v603_v0 = vmul.f32 %v1076_v36, %v599_v58 }
 0x1c9   : > { %v721_v5 = vmax.f32 %v717_v2, 0.0  ;;  %v628_v2 = vmul.f32 -0.5, %v624_v60  ;;  %v607_v12 = vadd.f32 0.1274148, %v603_v0 }
 0x1cb   : > { %v633_v15 = vmul.f32 1.442695, %v628_v2  ;;  %v611_v23 = vmul.f32 %v1076_v36, %v607_v12  ;;  %v615_v36 = vmax.f32 %v1441_v18, 0.0 }
 0x1cd   : > { %1085 = vpow2.f32 %v633_v15  ;;  %v619_v34 = vmul.f32 %v611_v23, %v1446_v22  ;;  %v616_v22 = vmax.f32 %v1443_v20, 0.0 }
 0x1ce   : > { %v718_v3 = vpop.f32.mrf.mxu1  ;;  %1087 = vpow2.f32 %v635_v33 }
 0x1cf   : > { %v719_v4 = vadd.f32 %v1065_v1, %v718_v3  ;;  %v597_v1 = vmul.f32 %v1465_v42, %v593_v59  ;;  %v604_v3 = vmul.f32 %v1078_v38, %v600_v61  ;;  %v639_v45 = vmul.f32 %v1084_v37, %v619_v34 }
 0x1d0   : > { %1089 = vpow2.f32 %v637_v39 }
 0x1d1   : > { %v722_v6 = vmax.f32 %v719_v4, 0.0  ;;  %v598_v4 = vmul.f32 %v1467_v44, %v594_v62  ;;  %v601_v13 = vadd.f32 -0.14224836, %v597_v1  ;;  %v608_v17 = vadd.f32 0.1274148, %v604_v3 }
 0x1d2   : > { %v517_v3 = vld [vmem:[#allocation2] sm:$0x1] }
 0x1d3   : > { %v723_v7 = vpack.c.bf16 %v722_v6, %v721_v5  ;;  %v511_v5 = vld [vmem:[%s1579_s8 + $0x10] sm:$0xff]  ;;  %v512_v6 = vld [vmem:[%s1579_s8 + $0x18] sm:$0xff]  ;;  %v602_v19 = vadd.f32 -0.14224836, %v598_v4  ;;  %v605_v26 = vmul.f32 %v1465_v42, %v601_v13  ;;  %v612_v30 = vmul.f32 %v1078_v38, %v608_v17  ;;  %v1086_v43 = vpop.eup %1085  ;;  %v1066_v38 = vld [vmem:[%s1578_s7] ss:$0 sm:$0xff] }
 0x1d4   : > { %v514_v10 = vpack.c.bf16 %v512_v6, %v511_v5  ;;  %v1088_v52 = vpop.eup %1087  ;;  %v1223_v4 = vmov 0   ;;  %v1067_v5 = vld [vmem:[%s1580_s9] ss:$0 sm:$0xff] }
 0x1d5   : > { %997 = vmatmul.msk.bf16.vlgmr.msra.gmra.mxu2 %vm727_vm8, %v723_v7  ;;  %v509_v7 = vld [vmem:[%s1579_s8] sm:$0xff]  ;;  %v606_v32 = vmul.f32 %v1467_v44, %v602_v19  ;;  %v609_v35 = vadd.f32 0.1274148, %v605_v26  ;;  %v620_v40 = vmul.f32 %v612_v30, %v1449_v24  ;;  %v643_v24 = vsub.f32 %v615_v36, %v639_v45  ;;  %1062 = vset.pattern.permute.xlu2 %v1223_v4 }
 0x1d6   : > { %783 = vmatpush.bf16.msra.mxu3 %v514_v10  ;;  %v513_v16 = vpack.c.bf16 %v510_v11, %v509_v7  ;;  %v1090_v56 = vpop.eup %1089  ;;  %1063 = vset.pattern.permute.xlu0 %v1223_v4 }
 0x1d7   : > { %v610_v41 = vadd.f32 0.1274148, %v606_v32  ;;  %v613_v46 = vmul.f32 %v1465_v42, %v609_v35  ;;  %v640_v47 = vmul.f32 %v1086_v43, %v620_v40  ;;  %v617_v42 = vmax.f32 %v1451_v25, 0.0  ;;  %806 = vperm.xlu2 %1062, %v517_v3  }
 0x1d9   : > { %v614_v48 = vmul.f32 %v1467_v44, %v610_v41  ;;  %v621_v51 = vmul.f32 %v613_v46, %v1458_v29  ;;  %v644_v18 = vsub.f32 %v616_v22, %v640_v47  ;;  %v618_v44 = vmax.f32 %v1454_v27, 0.0 }
 0x1da   : > { %784 = vmatpush.bf16.msra.mxu3 %v513_v16 }
 0x1db   : > { %v622_v55 = vmul.f32 %v614_v48, %v1461_v31  ;;  %v641_v20 = vmul.f32 %v1088_v52, %v621_v51 }
 0x1dd   : > { %v642_v58 = vmul.f32 %v1090_v56, %v622_v55  ;;  %v645_v60 = vsub.f32 %v617_v42, %v641_v20 }
 0x1df   : > { %v646_v61 = vsub.f32 %v618_v44, %v642_v58 }
 0x258   : > { %v740_v49 = vpop.f32.mrf.mxu2 }
 0x259   : > { %v741_v50 = vadd.f32 %v1066_v38, %v740_v49 }
 0x25b   : > { %v747_v53 = vrot.slane %v741_v50, 4  ;;  %v751_v54 = vadd.f32 %v741_v50, %v643_v24 }
 0x25d   : > { %v752_v57 = vadd.f32 %v747_v53, %v644_v18  ;;  %759 = vst [vmem:[#allocation1] ss:$2 sm:$0xff] %v751_v54 }
 0x25f   : > { %761 = vst [vmem:[#allocation1 + $0x1] ss:$2 sm:$0xff] %v752_v57 }
 0x260   : > { %v742_v59 = vpop.f32.mrf.mxu2 }
 0x261   : > { %v743_v29 = vadd.f32 %v1066_v38, %v742_v59 }
 0x263   : > { %v748_v62 = vrot.slane %v743_v29, 4  ;;  %v753_v63 = vadd.f32 %v743_v29, %v645_v60 }
 0x265   : > { %v754_v0 = vadd.f32 %v748_v62, %v646_v61  ;;  %763 = vst [vmem:[#allocation1 + $0x10] ss:$2 sm:$0xff] %v753_v63 }
 0x266   : > { %v766_v31 = vld.sshfl [vmem:[#allocation1] sm:$0xff pattern:$0x75316420] }
 0x267   : > { %765 = vst [vmem:[#allocation1 + $0x11] ss:$2 sm:$0xff] %v754_v0 }
 0x268   : > { %814 = vst [vmem:[#allocation1] ss:$2 sm:$0xff] %v751_v54 }
 0x269   : > { %816 = vst [vmem:[#allocation1 + $0x1] ss:$2 sm:$0xff] %v752_v57 }
 0x26e   : > { %v767_v25 = vld.sshfl [vmem:[#allocation1 + $0x10] sm:$0xff pattern:$0x75316420] }
 0x26f   : > { %v770_v1 = vpack.c.bf16 %v767_v25, %v766_v31  ;;  %818 = vst [vmem:[#allocation1 + $0x10] ss:$2 sm:$0xff] %v753_v63 }
 0x270   : > { %820 = vst [vmem:[#allocation1 + $0x11] ss:$2 sm:$0xff] %v754_v0  ;;  %v821_v2 = vld.sshfl [vmem:[#allocation1] sm:$0xff pattern:$0x75316420] }
 0x271   : > { %998 = vmatmul.msk.bf16.vlgmr.msra.gmra.mxu3 %vm520_vm0, %v770_v1  ;;  %825 = vst.msk [vmem:[%s478_s17] sm:$0xff] %vm520_vm0, %v821_v2 }
 0x277   : > { %v822_v27 = vld.sshfl [vmem:[#allocation1 + $0x10] sm:$0xff pattern:$0x75316420] }
 0x278   : > { %826 = vst.msk [vmem:[%s478_s17 + $0x8] sm:$0xff] %vm520_vm0, %v822_v27 }
 0x2f4   : > { %v786_v6 = vpop.f32.mrf.mxu3 }
 0x2f5   : > { %v787_v7 = vadd.f32 %v1067_v5, %v786_v6 }
 0x2f7   : > { %v791_v9 = vmax.f32 %v787_v7, 0.0 }
 0x2f9   : > { %v796_v10 = vmul.f32 %v1068_v8, %v791_v9 }
 0x2fb   : > { %v798_v11 = vsel %vm727_vm8, %v796_v10, 0.0 }
 0x2fc   : > { %v788_v12 = vpop.f32.mrf.mxu3  ;;  %799 = vadd.xlane.f32.xlu0 %v798_v11 }
 0x2fd   : > { %v789_v13 = vadd.f32 %v1067_v5, %v788_v12 }
 0x2ff   : > { %v792_v14 = vmax.f32 %v789_v13, 0.0 }
 0x301   : > { %v797_v15 = vmul.f32 %v1068_v8, %v792_v14 }
 0x303   : > { %v801_v16 = vsel %vm727_vm8, %v797_v15, 0.0 }
 0x304   : > { %1148 = shalt.err (!%p1145_p7)
}
 0x305   : > { %s1224_s14 = smov 128   ;;  %s1225_s20 = smov 8   ;;  %802 = vadd.xlane.f32.xlu1 %v801_v16  ;;  %v807_v17 = vpop.permute.xlu2 %806  ;;  %v829_v23 = vlaneseq  ;;  %vm834_vm9 = vcmask 130112   ;;  %vm837_vm10 = vcmask 122880  }
 0x306   : > { %1008 = dma.vmem_to_hbm [thread:$0]  (%p1349_p11), %s857_s19, 256, %s859_s26, %s840_s16, %s1224_s14, %s1224_s14, %s1225_s20   ;;  %v809_v19 = vperm.slane %v807_v17, 0 }
 0x307   : > { %v830_v28 = vand.u32 127, %v829_v23  ;;  %s1602_s22 = sld [smem:[#allocation17_spill]]  ;;  %s484_s27 = scalar_lea.vmem [#allocation7], %s1385_s23 }
 0x308   : > { %s872_s19 = sshll.u32 %s484_s27, 4  ;;  %s845_s16 = scalar_lea.sflag [#allocation8], %s1385_s23  ;;  %s873_s19 = int_to_ptr.vmem [resolvable:$true] %s872_s19 }
 0x309   : > { %v832_v33 = vadd.s32 4294967288, %v830_v28 }
 0x30d   : > { %s870_s13 = scalar_lea.hbm %s1602_s22, %s1320_s11  ;;  %s1169_s17 = scalar_lea.hbm %s1602_s22, 2 }
 0x30e   : > { %s874_s26 = sshll.u32 %s870_s13, 4  ;;  %s875_s26 = int_to_ptr.hbm [resolvable:$true] %s874_s26 }
 0x30f   : > { %s1163_s29 = sshra.s32 %s875_s26, 4  ;;  %s1164_s29 = int_to_ptr.hbm [resolvable:$true] %s1163_s29 }
 0x310   : > { %s1165_s11 = scalar_lea.hbm %s1164_s29, 1  ;;  %p1170_p2 = scmp.lt.s32.totalorder %s1164_s29, %s1602_s22 }
 0x311   : > { %p1166_p5 = scmp.ne.s32.totalorder %s1164_s29, %s1165_s11  ;;  %p1171_p9 = scmp.lt.s32.totalorder %s1169_s17, %s1165_s11 }
 0x313   : > { %p1167_p8 = pnand %p1166_p5, %p1349_p11  ;;  %p1172_p6 = por %p1171_p9, %p1170_p2 }
 0x315   : > { %p1168_p10 = pneg %p1167_p8 }
 0x317   : > { %p1173_p13 = pnand %p1172_p6, %p1168_p10 }
 0x36f   : > { %v800_v21 = vpop.xlane.xlu0 %799 }
 0x370   : > { %v810_v26 = vadd.f32 %v809_v19, %v800_v21 }
 0x372   : > { %v812_v32 = vmax.f32 %v810_v26, 0.0 }
 0x374   : > { %v831_v37 = vperm.slane %v812_v32, %v830_v28 }
 0x378   : > { %v803_v30 = vpop.xlane.xlu1 %802 }
 0x379   : > { %v811_v34 = vadd.f32 %v809_v19, %v803_v30 }
 0x37b   : > { %v813_v35 = vmax.f32 %v811_v34, 0.0 }
 0x37d   : > { %v833_v39 = vperm.slane %v813_v35, %v832_v33 }
 0x37f   : > { %v835_v40 = vsel %vm834_vm9, %v833_v39, %v831_v37 }
 0x380   : > { %838 = vst.msk [vmem:[%s484_s27] sm:$0x1] %vm837_vm10, %v835_v40 }
 0x381   : > { %1176 = shalt.err (!%p1173_p13)
}
 0x382   : > { %1009 = dma.vmem_to_hbm [thread:$0]  (%p1349_p11), %s873_s19, 16, %s875_s26, %s845_s16  }
 0x383 PF: > { %s1603_s23 = sld [smem:[#allocation12_spill]]  ;;  %p1605_p0 = scmp.ge.s32.totalorder %s1219_s30, 2 }
 0x385   : > { %p1017_p1 = pnand %p1605_p0, %p1353_p12 }
 0x387   : > { %p1018_p3 = pneg %p1017_p1 }
 0x389   : > { %s886_s25 = sand.u32 1, %s1603_s23  }
 0x38a   : > { %s887_s13 = scalar_lea.sflag [#allocation5], %s886_s25 }
 0x38b   : > { %1198 = dma.done.wait (%p1018_p3), %s887_s13, 256  }
 0x38c   : > { %1200 = vsyncadd (%p1018_p3), %s887_s13, 4294967040  ;;  %s897_s27 = scalar_lea.sflag [#allocation8], %s886_s25 }
 0x38d   : > { %1202 = dma.done.wait (%p1018_p3), %s897_s27, 16  }
 0x38e   : > { %1204 = vsyncadd (%p1018_p3), %s897_s27, 4294967280  ;;  %s1606_s30 = sld [smem:[#allocation14_spill]]  ;;  %s1609_s27 = smov %s1211_s28 }
 0x38f   : > { %s1607_s29 = sld [smem:[#allocation13_spill]] }
 0x390   : > { %s1608_s21 = sld [smem:[#allocation15_spill]] }
 0x394   : > { %p32_p11 = scmp.ge.s32.totalorder %s1606_s30, 4  }
 0x395   : > { %s1610_s28 = smov %s1607_s29 }
 0x396   : > { %s1611_s29 = smov %s1608_s21  ;;  %34 = sbr.rel (!%p32_p11) target bundleno = 10 (0xa), region = 139 }
 0x39b   :  { %902 = vsyncpa [#allocation4], 1 }
 0x39c   :  { %904 = vsyncpa [#allocation4 + $0x1], 1 }
 0x39d   :  { %905 = vsyncpa [#allocation5], 1 }
 0x39e   :  { %907 = vsyncpa [#allocation5 + $0x1], 1 }
 0x39f   :  { %908 = vsyncpa [#allocation8], 1 }
 0x3a0   :  { %910 = vsyncpa [#allocation8 + $0x1], 1 }

</bundles_post_ra>
